<compile_context>
chip_gen: v6e
topology: v6e:2x2x1
jax: 0.10.0
libtpu: 0.0.40
codegen_flags: <defaults>
</compile_context>

<pallas_src>
import functools
import math

import jax
import jax.numpy as jnp
from jax.experimental import pallas as pl
from jax.experimental.pallas import tpu as pltpu


def _round_up(n: int, mult: int) -> int:
    return ((n + mult - 1) // mult) * mult


def _cdiv(a: int, b: int) -> int:
    return (a + b - 1) // b


# Conservative VMEM buffer budget that fits every generation's scoped limit
# once vmem_limit_bytes is raised accordingly (v7x: 64 MiB physical / 32 MiB
# scoped default; v5e: 16 MiB scoped default).
_VMEM_BUDGET = 24 * 1024 * 1024
# Above this (double-buffered) resident-weight size we switch to K tiling.
_K_TILE_WEIGHT_THRESHOLD = 8 * 1024 * 1024


# ----------------------------------------------------------------------------- kernels
def _dense_kernel(x_ref, w_ref, b_ref, o_ref):
    # x: (tm, Cin) native dtype; w: (Cin, Cout_pad) compute dtype; b: (1, Cout_pad) f32
    x = x_ref[...].astype(w_ref.dtype)          # cast in-kernel, not in the wrapper
    y = jnp.dot(x, w_ref[...], preferred_element_type=jnp.float32)
    o_ref[...] = jnp.maximum(y + b_ref[...], 0.0).astype(o_ref.dtype)


def _dense_kernel_ktiled(x_ref, w_ref, b_ref, o_ref, acc_ref):
    # Grid = (M tiles, K tiles); K is the reduction axis (last, "arbitrary").
    k = pl.program_id(1)

    @pl.when(k == 0)
    def _():
        acc_ref[...] = jnp.zeros_like(acc_ref)

    x = x_ref[...].astype(w_ref.dtype)
    acc_ref[...] += jnp.dot(x, w_ref[...], preferred_element_type=jnp.float32)

    @pl.when(k == pl.num_programs(1) - 1)
    def _():
        o_ref[...] = jnp.maximum(acc_ref[...] + b_ref[...], 0.0).astype(o_ref.dtype)


# ----------------------------------------------------------------------------- param prep
def prepare_dense_params(weight, bias, *, weight_dtype=jnp.bfloat16):
    """One-time (init-time) weight prep: transpose, cast, pad Cout to a lane-dense
    multiple of 128.  Keeps the per-call hot path free of weight HBM passes.

    weight: (Cout, Cin), bias: (Cout,)  ->  w_t: (Cin, Cout_pad), b: (1, Cout_pad) f32
    """
    cout, _ = weight.shape
    cout_pad = _round_up(cout, 128)
    w_t = jnp.asarray(weight).T.astype(weight_dtype)             # (Cin, Cout)
    b = jnp.asarray(bias).astype(jnp.float32).reshape(1, cout)   # bias added in f32
    if cout_pad != cout:
        w_t = jnp.pad(w_t, ((0, 0), (0, cout_pad - cout)))
        b = jnp.pad(b, ((0, 0), (0, cout_pad - cout)))
    return w_t, b


def _pick_k_tile(cin, cout_pad, w_bytes, weight_budget_bytes):
    """Largest K tile that is a multiple of 128, divides Cin, and keeps the
    (double-buffered) weight tile within budget.  None -> keep weight resident."""
    if cin % 128 != 0:
        return None
    max_tk = min(cin, (weight_budget_bytes // (2 * cout_pad * w_bytes)) // 128 * 128)
    best = None
    t = 128
    while t <= max_tk:
        if cin % t == 0:
            best = t
        t += 128
    return best


# ----------------------------------------------------------------------------- forward
@functools.partial(
    jax.jit, static_argnames=("out_features", "out_dtype", "row_tile", "k_tile")
)
def dense_forward(x, w_prepped, b_prepped, *, out_features, out_dtype=None,
                  row_tile=512, k_tile=None):
    """x: (..., Cin); w_prepped: (Cin, Cout_pad); b_prepped: (1, Cout_pad) f32.

    Returns ReLU(x @ W.T + b) with shape (..., out_features).
    Pass `out_dtype=jnp.bfloat16` when the consumer accepts bf16 (halves output
    HBM writeback).  Precision of the matmul follows w_prepped's dtype.
    """
    cin, cout_pad = w_prepped.shape
    if x.shape[-1] != cin:
        raise ValueError("x last dim must equal in_features")
    if out_features > cout_pad:
        raise ValueError("out_features larger than padded weight")
    if row_tile % 16 != 0:
        raise ValueError("row_tile must be a multiple of 16")

    lead = x.shape[:-1]
    m = math.prod(lead) if lead else 1
    out_dtype = x.dtype if out_dtype is None else jnp.dtype(out_dtype)

    x_bytes = jnp.dtype(x.dtype).itemsize
    w_bytes = jnp.dtype(w_prepped.dtype).itemsize
    o_bytes = jnp.dtype(out_dtype).itemsize

    x2 = x.reshape(m, cin)

    # --- K tiling only when the resident weight would blow the VMEM budget ---
    if k_tile is None and 2 * cin * cout_pad * w_bytes > _K_TILE_WEIGHT_THRESHOLD:
        k_tile = _pick_k_tile(cin, cout_pad, w_bytes, _K_TILE_WEIGHT_THRESHOLD)
    if k_tile is not None and (k_tile % 128 != 0 or cin % k_tile != 0):
        raise ValueError("k_tile must be a multiple of 128 that divides in_features")

    # --- VMEM-budget-driven row tile (double-buffered inputs/outputs) ---
    if k_tile is None:
        fixed = 2 * cin * cout_pad * w_bytes + 2 * cout_pad * 4          # W + bias
        per_row = 2 * cin * x_bytes + 2 * cout_pad * o_bytes             # x + out
    else:
        fixed = 2 * k_tile * cout_pad * w_bytes + 2 * cout_pad * 4
        per_row = 2 * k_tile * x_bytes + 2 * cout_pad * o_bytes + 4 * cout_pad  # + acc
    tm_max = max(16, min(row_tile, ((_VMEM_BUDGET - fixed) // per_row) // 16 * 16))

    if m <= 256:
        # Tiny M: one block; pad rows to a 16-multiple (negligible at this size)
        # so the block never exceeds the array.
        m_pad = _round_up(m, 16)
        tm = min(m_pad, tm_max)
        if m_pad != m:
            x2 = jnp.pad(x2, ((0, m_pad - m), (0, 0)))
    else:
        # Large M: no row padding — ragged last tile (OOB output writes masked,
        # garbage input rows only affect rows we never read back).  At least two
        # row blocks so the "parallel" axis can shard across both v7x TCs.
        m_pad = m
        tm = min(tm_max, _round_up(_cdiv(m, 2), 16))

    grid_m = _cdiv(m_pad, tm)

    vmem_needed = fixed + tm * per_row
    vmem_limit = int(min(48 * 1024 * 1024,
                         max(vmem_needed + 4 * 1024 * 1024, 32 * 1024 * 1024)))

    cost = pl.CostEstimate(
        flops=2 * m_pad * cin * cout_pad,
        transcendentals=0,
        bytes_accessed=(m_pad * cin * x_bytes + cin * cout_pad * w_bytes
                        + cout_pad * 4 + m_pad * cout_pad * o_bytes),
    )

    if k_tile is None:
        grid = (grid_m,)
        in_specs = [
            pl.BlockSpec((tm, cin), lambda i: (i, 0)),          # row tile of x
            pl.BlockSpec((cin, cout_pad), lambda i: (0, 0)),    # full weight, resident
            pl.BlockSpec((1, cout_pad), lambda i: (0, 0)),      # bias
        ]
        out_specs = pl.BlockSpec((tm, cout_pad), lambda i: (i, 0))
        kernel = _dense_kernel
        scratch_shapes = ()
        dims = ("parallel",)
    else:
        grid = (grid_m, cin // k_tile)
        in_specs = [
            pl.BlockSpec((tm, k_tile), lambda i, k: (i, k)),
            pl.BlockSpec((k_tile, cout_pad), lambda i, k: (k, 0)),
            pl.BlockSpec((1, cout_pad), lambda i, k: (0, 0)),
        ]
        out_specs = pl.BlockSpec((tm, cout_pad), lambda i, k: (i, 0))
        kernel = _dense_kernel_ktiled
        scratch_shapes = (pltpu.VMEM((tm, cout_pad), jnp.float32),)
        dims = ("parallel", "arbitrary")

    out2 = pl.pallas_call(
        kernel,
        out_shape=jax.ShapeDtypeStruct((m_pad, cout_pad), out_dtype),
        grid_spec=pltpu.PrefetchScalarGridSpec(
            num_scalar_prefetch=0,
            grid=grid,
            in_specs=in_specs,
            out_specs=out_specs,
            scratch_shapes=scratch_shapes,
        ),
        compiler_params=pltpu.CompilerParams(
            dimension_semantics=dims,
            vmem_limit_bytes=vmem_limit,
        ),
        cost_estimate=cost,
    )(x2, w_prepped, b_prepped)

    return out2[:m, :out_features].reshape(*lead, out_features)


# TODO(synk): dropout (drop_rate > 0) not implemented — the module defaults to
#             drop_rate=0.0 (identity) and eval-mode dropout is identity;
#             `with_bn` is unused in the reference forward().


# ----------------------------------------------------------------------------- self-test
def _ref_dense(x, weight, bias):
    # Reference with the same bf16-quantized operands the kernel consumes
    # (f32 accumulation in both paths), so only accumulation order differs.
    xq = x.astype(jnp.bfloat16).astype(jnp.float32)
    wq = weight.astype(jnp.bfloat16).astype(jnp.float32)
    return jnp.maximum(jnp.einsum("...c,oc->...o", xq, wq) + bias, 0.0)


def _make_params(key, in_features, out_features):
    k_w, k_b = jax.random.split(key)
    bound = 1.0 / (in_features ** 0.5)
    weight = jax.random.uniform(k_w, (out_features, in_features),
                                minval=-bound, maxval=bound, dtype=jnp.float32)
    bias = jax.random.uniform(k_b, (out_features,),
                              minval=-bound, maxval=bound, dtype=jnp.float32)
    return weight, bias


if __name__ == "__main__":
    key = jax.random.PRNGKey(0)
    k1, k2, k3, k4, k5, k6 = jax.random.split(key, 6)

    # ---- Test 1: small PointCNN-ish shapes (batch=2, points=8, Cin=32 -> Cout=64)
    x1 = jax.random.normal(k1, (2, 8, 32), dtype=jnp.float32)
    w1, b1 = _make_params(k2, 32, 64)
    w1p, b1p = prepare_dense_params(w1, b1)            # one-time prep
    out1 = dense_forward(x1, w1p, b1p, out_features=64)
    jax.block_until_ready(out1)
    ref1 = _ref_dense(x1, w1, b1)
    assert out1.shape == (2, 8, 64)
    assert jnp.allclose(out1, ref1, atol=1e-3, rtol=1e-3)

    # ---- Test 2: large-M path with ragged last row tile + Cout padding (48 -> 128)
    x2 = jax.random.normal(k3, (2, 300, 32), dtype=jnp.float32)
    w2, b2 = _make_params(k4, 32, 48)
    w2p, b2p = prepare_dense_params(w2, b2)
    out2 = dense_forward(x2, w2p, b2p, out_features=48)
    jax.block_until_ready(out2)
    ref2 = _ref_dense(x2, w2, b2)
    assert out2.shape == (2, 300, 48)
    assert jnp.allclose(out2, ref2, atol=1e-3, rtol=1e-3)

    # ---- Test 3: K-tiled accumulator path (forced via k_tile) for wide Cin
    x3 = jax.random.normal(k5, (2, 8, 256), dtype=jnp.float32)
    w3, b3 = _make_params(k6, 256, 128)
    w3p, b3p = prepare_dense_params(w3, b3)
    out3 = dense_forward(x3, w3p, b3p, out_features=128, k_tile=128)
    jax.block_until_ready(out3)
    ref3 = _ref_dense(x3, w3, b3)
    assert out3.shape == (2, 8, 128)
    assert jnp.allclose(out3, ref3, atol=1e-3, rtol=1e-3)

    print("KERNEL_OK")
</pallas_src>

<mosaic_0001>
module attributes {stable_mosaic.version = 11 : i64} {
  func.func @_dense_kernel(%arg0: i32, %arg1: memref<16x32xf32, #tpu.memory_space<vmem>>, %arg2: memref<32x128xbf16, #tpu.memory_space<vmem>>, %arg3: memref<1x128xf32, #tpu.memory_space<vmem>>, %arg4: memref<16x128xf32, #tpu.memory_space<vmem>>) attributes {dimension_semantics = [#tpu.dimension_semantics<parallel>], iteration_bounds = array<i64: 1>, scalar_prefetch = 0 : i64, scratch_operands = 0 : i64, tpu.core_type = #tpu.core_type<tc>, window_params = [{transform_indices = @transform_0, window_bounds = array<i64: 16, 32>}, {pipeline_mode = #tpu.pipeline_mode<synchronous>, transform_indices = @transform_1, window_bounds = array<i64: 32, 128>}, {pipeline_mode = #tpu.pipeline_mode<synchronous>, transform_indices = @transform_2, window_bounds = array<i64: 1, 128>}, {transform_indices = @transform_3, window_bounds = array<i64: 16, 128>}]} {
    %c0 = arith.constant 0 : index
    %c0_0 = arith.constant 0 : index
    %0 = vector.load %arg1[%c0, %c0_0] : memref<16x32xf32, #tpu.memory_space<vmem>>, vector<16x32xf32>
    %1 = arith.truncf %0 : vector<16x32xf32> to vector<16x32xbf16>
    %c0_1 = arith.constant 0 : index
    %c0_2 = arith.constant 0 : index
    %2 = vector.load %arg2[%c0_1, %c0_2] : memref<32x128xbf16, #tpu.memory_space<vmem>>, vector<32x128xbf16>
    %cst = arith.constant dense<0.000000e+00> : vector<16x128xf32>
    %3 = tpu.matmul %1, %2, %cst {dimension_numbers = #tpu.dot_dimension_numbers<[1], [0], [0], [1], [0, 0, 1, 1], [], []>} : vector<16x32xbf16>, vector<32x128xbf16>, vector<16x128xf32> -> vector<16x128xf32>
    %c0_3 = arith.constant 0 : index
    %c0_4 = arith.constant 0 : index
    %4 = vector.load %arg3[%c0_3, %c0_4] : memref<1x128xf32, #tpu.memory_space<vmem>>, vector<1x128xf32>
    %5 = vector.broadcast %4 : vector<1x128xf32> to vector<16x128xf32>
    %6 = arith.addf %3, %5 : vector<16x128xf32>
    %cst_5 = arith.constant 0.000000e+00 : f32
    %7 = vector.broadcast %cst_5 : f32 to vector<16x128xf32>
    %8 = arith.maximumf %6, %7 : vector<16x128xf32>
    %c0_6 = arith.constant 0 : index
    %c0_7 = arith.constant 0 : index
    %9 = vector.load %arg4[%c0_6, %c0_7] : memref<16x128xf32, #tpu.memory_space<vmem>>, vector<16x128xf32>
    tpu.vector_store %arg4[%c0_6, %c0_7], %8 {strides = array<i32>} : memref<16x128xf32, #tpu.memory_space<vmem>>, vector<16x128xf32>,
    return
  }
  func.func @transform_0(%arg0: i32) -> (i32, i32) {
    %c0_i32 = arith.constant 0 : i32
    %c0_i32_0 = arith.constant 0 : i32
    return %arg0, %c0_i32 : i32, i32
  }
  func.func @transform_1(%arg0: i32) -> (i32, i32) {
    %c0_i32 = arith.constant 0 : i32
    %c0_i32_0 = arith.constant 0 : i32
    %c0_i32_1 = arith.constant 0 : i32
    return %c0_i32, %c0_i32_0 : i32, i32
  }
  func.func @transform_2(%arg0: i32) -> (i32, i32) {
    %c0_i32 = arith.constant 0 : i32
    %c0_i32_0 = arith.constant 0 : i32
    %c0_i32_1 = arith.constant 0 : i32
    return %c0_i32, %c0_i32_0 : i32, i32
  }
  func.func @transform_3(%arg0: i32) -> (i32, i32) {
    %c0_i32 = arith.constant 0 : i32
    %c0_i32_0 = arith.constant 0 : i32
    return %arg0, %c0_i32 : i32, i32
  }
}

</mosaic_0001>

<bundles_post_ra>
// kernel: dense_forward.1
= control target key start
LH: loop header
LB: loop body
LE: loop exit
PB: predicated region body
PF: predicated region fallthrough
CT: control target
= control target key end

     0   :  { %8 = vsyncpa [#allocation3], 0  ;;  %s236_s0 = inlined_call_operand.hbm [shape: f32[16,32], index: 0, kind: input, shape index: {}]   ;;  %s237_s1 = inlined_call_operand.hbm [shape: bf16[32,128], index: 1, kind: input, shape index: {}]   ;;  %s238_s2 = inlined_call_operand.vmem [shape: f32[1,128], index: 2, kind: input, shape index: {}]   ;;  %s239_s3 = inlined_call_operand.vmem [shape: f32[16,128], index: 3, kind: output, shape index: {}]  }
   0x1   :  { %9 = vsyncpa [#allocation5], 0  ;;  %s193_s12 = smov [#allocation2]  }
   0x2   :  { %s15_s13 = sshll.u32 %s193_s12, 4  ;;  %s16_s13 = int_to_ptr.vmem [resolvable:$true] %s15_s13 }
   0x3   :  { %s157_s14 = scalar_lea.vmem %s16_s13, 256  ;;  %p162_p1 = scmp.lt.s32.totalorder %s16_s13, %s16_s13 }
   0x4   :  { %p158_p0 = scmp.ne.s32.totalorder %s16_s13, %s157_s14  ;;  %p163_p2 = scmp.lt.s32.totalorder %s157_s14, %s157_s14 }
   0x6   :  { %p164_p3 = por %p163_p2, %p162_p1 }
   0x8   :  { %p165_p4 = pnand %p164_p3, %p158_p0 }
   0xa   :  { %168 = shalt.err (!%p165_p4)
}
   0xb   :  { %s194_s15 = smov 128   ;;  %s195_s16 = smov 8  }
   0xc   :  { %21 = dma.hbm_to_vmem [thread:$0]  %s236_s0, 256, %s16_s13, [#allocation3], %s194_s15, %s194_s15, %s195_s16  }
   0xd   :  { %s196_s19 = smov [#allocation4]  }
   0xe   :  { %s27_s20 = sshll.u32 %s196_s19, 4  ;;  %s28_s20 = int_to_ptr.vmem [resolvable:$true] %s27_s20 }
   0xf   :  { %s177_s21 = scalar_lea.vmem %s28_s20, 256  ;;  %p182_p6 = scmp.lt.s32.totalorder %s28_s20, %s28_s20 }
  0x10   :  { %p178_p5 = scmp.ne.s32.totalorder %s28_s20, %s177_s21  ;;  %p183_p7 = scmp.lt.s32.totalorder %s177_s21, %s177_s21 }
  0x12   :  { %p184_p8 = por %p183_p7, %p182_p6 }
  0x14   :  { %p185_p9 = pnand %p184_p8, %p178_p5 }
  0x16   :  { %188 = shalt.err (!%p185_p9)
}
  0x17   :  { %s197_s22 = smov 64   ;;  %s198_s23 = smov 4  }
  0x18   :  { %33 = dma.hbm_to_vmem [thread:$0]  %s237_s1, 256, %s28_s20, [#allocation5], %s197_s22, %s197_s22, %s198_s23  }
  0x19   :  { %189 = dma.done.wait [#allocation3], 256  }
  0x1a   :  { %190 = vsyncadd [#allocation3], 4294967040 }
  0x1b   :  { %191 = dma.done.wait [#allocation5], 256  }
  0x1c   :  { %192 = vsyncadd [#allocation5], 4294967040  ;;  %v199_v0 = vmov 0.0   ;;  %vm200_vm0 = vmmov 0   ;;  %v147_v1 = vld [vmem:[#allocation4 + $0x8] sm:$0xff]   ;;  %v148_v2 = vld [vmem:[#allocation4] sm:$0xff]  }
  0x1d   :  { %131 = vmatprep.subr.bf16.mxu0 %v199_v0  ;;  %135 = vmatprep.mubr.msk.bf16.mxu0 %vm200_vm0, %v199_v0  ;;  %v43_v3 = vld [vmem:[#allocation2] sm:$0xff]  ;;  %v44_v4 = vld [vmem:[#allocation2 + $0x8] sm:$0xff]  ;;  %vm69_vm1 = vcmask 261120  }
  0x1e   :  { %132 = vmatpush3.bf16.msra.mxu0 %v147_v1  ;;  %v45_v5 = vpack.c.bf16 %v44_v4, %v43_v3  ;;  %v124_v6 = vld [vmem:[%s238_s2] ss:$0 sm:$0xff] }
  0x1f   :  { %133 = vmatprep.subr.bf16.mxu0 %v199_v0 }
  0x22   :  { %134 = vmatpush3.bf16.msra.mxu0 %v148_v2 }
  0x25   :  { %136 = vmatmul.mubr.msk.bf16.vlgmr.msra.gmra.mxu0 %vm69_vm1, %v45_v5 }
  0xe5   :  { %v107_v7 = vpop.f32.mrf.mxu0 }
  0xe6   :  { %v108_v8 = vadd.f32 %v124_v6, %v107_v7 }
  0xe7   :  { %v137_v9 = vpop.f32.mrf.mxu0 }
  0xe8   :  { %v114_v10 = vmax.f32 %v108_v8, 0.0 }
  0xe9   :  { %v110_v11 = vpop.f32.mrf.mxu0 }
  0xea   :  { %116 = vst [vmem:[%s239_s3] sm:$0xff] %v114_v10  ;;  %v111_v12 = vadd.f32 %v124_v6, %v110_v11 }
  0xeb   :  { %v138_v13 = vpop.f32.mrf.mxu0 }
  0xec   :  { %v115_v14 = vmax.f32 %v111_v12, 0.0 }
  0xee   :  { %117 = vst [vmem:[%s239_s3 + $0x8] sm:$0xff] %v115_v14 }
  0xef   :  { %122 = vsyncpa [#allocation3], 1 }
  0xf0   :  { %123 = vsyncpa [#allocation5], 1 }

</bundles_post_ra>
